<compile_context>
chip_gen: v7x
topology: tpu7x:2x2x1
jax: 0.10.0
libtpu: 0.0.40
codegen_flags: <defaults>
</compile_context>

<pallas_src>
import jax
import jax.numpy as jnp
from jax.experimental import pallas as pl
from jax.experimental.pallas import tpu as pltpu


def fused_ac_kernel(x_ref, w_ref, b_ref, out_ref):
    # Single MXU matmul over the fused [F, Dp+Dv] weight, f32 accumulate,
    # bias add + ReLU on the VPU, one lane-dense store.
    acc = jnp.dot(x_ref[...], w_ref[...], preferred_element_type=jnp.float32)
    acc = acc + b_ref[...]                      # broadcast [1, D] over [tb, D]
    out_ref[...] = jnp.maximum(acc, 0.0).astype(out_ref.dtype)


def fuse_ac_params(w_pi, b_pi, w_vf, b_vf):
    """Fuse the two heads ONCE (parameter-construction time), not per forward call."""
    w = jnp.concatenate([w_pi, w_vf], axis=1)   # [F, Dp+Dv]
    b = jnp.concatenate([b_pi, b_vf], axis=1)   # [1, Dp+Dv]
    return w, b


def _round_up(x, m):
    return ((x + m - 1) // m) * m


def my_ac_model_forward_fused(
    x, w, b, *,
    batch_tile=1024,
    min_pallas_batch=128,
    vmem_budget_bytes=24 * 1024 * 1024,
    compute_dtype=None,
    x_buffer_count=None,
):
    """Fused forward: ReLU(x @ W + b), W/b already fused via fuse_ac_params.

    Returns the lane-dense fused [B, Dp+Dv] activation (consumers index into
    lane halves; the split is NOT done here to keep output traffic single-pass).
    """
    B, F = x.shape
    D = w.shape[1]
    out_dtype = x.dtype

    # Optional bf16 inputs (v5e/v6e: full-rate MXU, half the streamed bytes).
    # Accumulation stays f32 inside the kernel.
    if compute_dtype is not None:
        x = x.astype(compute_dtype)
        w = w.astype(compute_dtype)

    x_isz = jnp.dtype(x.dtype).itemsize
    w_isz = jnp.dtype(w.dtype).itemsize
    b_isz = jnp.dtype(b.dtype).itemsize
    o_isz = jnp.dtype(out_dtype).itemsize

    cost = pl.CostEstimate(
        flops=2 * B * F * D,
        transcendentals=0,
        bytes_accessed=(x.size * x_isz + w.size * w_isz
                        + b.size * b_isz + B * D * o_isz),
    )

    # Tiny problems: plain XLA so it fuses into the surrounding graph; a
    # pallas_call launch + DMA setup dominates wall time at this size.
    if B < min_pallas_batch:
        acc = jnp.dot(x, w, preferred_element_type=jnp.float32) + b
        return jnp.maximum(acc, 0.0).astype(out_dtype)

    resident_bytes = F * D * w_isz + D * b_isz           # W + b stay resident
    per_row_bytes = 2 * (F * x_isz + D * o_isz)          # double-buffered x + out
    whole_bytes = B * F * x_isz + B * D * o_isz + resident_bytes

    if B <= batch_tile and whole_bytes <= vmem_budget_bytes:
        # Grid-less: full arrays in VMEM, no pipeline bookkeeping.
        return pl.pallas_call(
            fused_ac_kernel,
            out_shape=jax.ShapeDtypeStruct((B, D), out_dtype),
            in_specs=[
                pl.BlockSpec(memory_space=pltpu.MemorySpace.VMEM),
                pl.BlockSpec(memory_space=pltpu.MemorySpace.VMEM),
                pl.BlockSpec(memory_space=pltpu.MemorySpace.VMEM),
            ],
            out_specs=pl.BlockSpec(memory_space=pltpu.MemorySpace.VMEM),
            cost_estimate=cost,
        )(x, w, b)

    # Batch-tiled path: derive tb from the VMEM budget (v7x: 64 MiB physical,
    # 32 MiB scoped default -> keep resident W + double-buffered x/out tiles
    # inside the budget), floor/align to 8 sublanes.
    avail = max(vmem_budget_bytes - resident_bytes, 8 * per_row_bytes)
    tb = min(batch_tile, avail // per_row_bytes, _round_up(B, 8))
    tb = max(8, (tb // 8) * 8)

    steps = pl.cdiv(B, tb)
    # Keep the "parallel" batch grid length even so both v7x TensorCores get work.
    if steps > 1 and steps % 2 == 1:
        tb = max(8, _round_up(pl.cdiv(B, steps + 1), 8))
        steps = pl.cdiv(B, tb)

    x_spec_kwargs = {}
    if x_buffer_count is not None:
        # v5e knob: deeper buffering on the x stream if DMA is exposed.
        x_spec_kwargs["pipeline_mode"] = pl.Buffered(x_buffer_count)

    return pl.pallas_call(
        fused_ac_kernel,
        out_shape=jax.ShapeDtypeStruct((B, D), out_dtype),
        grid=(steps,),
        in_specs=[
            pl.BlockSpec((tb, F), lambda i: (i, 0), **x_spec_kwargs),
            pl.BlockSpec((F, D), lambda i: (0, 0)),   # weights VMEM-resident
            pl.BlockSpec((1, D), lambda i: (0, 0)),   # bias VMEM-resident
        ],
        out_specs=pl.BlockSpec((tb, D), lambda i: (i, 0)),
        compiler_params=pltpu.CompilerParams(
            dimension_semantics=("parallel",),
            vmem_limit_bytes=32 * 1024 * 1024,
        ),
        cost_estimate=cost,
    )(x, w, b)


def my_ac_model_forward(x, w_pi, b_pi, w_vf, b_vf, **kwargs):
    """Module-compatible API returning (actor, critic).

    NOTE: prefer fuse_ac_params(...) once + my_ac_model_forward_fused(...) in hot
    loops; this wrapper re-fuses weights and slices the output per call and only
    exists for drop-in parity with MyACModel.forward.
    """
    w, b = fuse_ac_params(w_pi, b_pi, w_vf, b_vf)
    dp = w_pi.shape[1]
    fused = my_ac_model_forward_fused(x, w, b, **kwargs)
    return fused[:, :dp], fused[:, dp:]


if __name__ == "__main__":
    features_dim = 32
    last_layer_dim_pi = 64
    last_layer_dim_vf = 64

    key = jax.random.PRNGKey(0)
    kx, kwp, kbp, kwv, kbv = jax.random.split(key, 5)

    # Deterministic parameter init (mimics torch.nn.Linear uniform 1/sqrt(fan_in)).
    bound = 1.0 / (features_dim ** 0.5)
    w_pi = jax.random.uniform(kwp, (features_dim, last_layer_dim_pi),
                              minval=-bound, maxval=bound, dtype=jnp.float32)
    b_pi = jax.random.uniform(kbp, (1, last_layer_dim_pi),
                              minval=-bound, maxval=bound, dtype=jnp.float32)
    w_vf = jax.random.uniform(kwv, (features_dim, last_layer_dim_vf),
                              minval=-bound, maxval=bound, dtype=jnp.float32)
    b_vf = jax.random.uniform(kbv, (1, last_layer_dim_vf),
                              minval=-bound, maxval=bound, dtype=jnp.float32)

    # Fuse ONCE at parameter-construction time, reuse across all forward calls.
    w_fused, b_fused = fuse_ac_params(w_pi, b_pi, w_vf, b_vf)

    def ref(xb):
        return (jnp.maximum(xb @ w_pi + b_pi, 0.0),
                jnp.maximum(xb @ w_vf + b_vf, 0.0))

    # Exercise all dispatch paths:
    #   B=8    -> plain-XLA tiny-batch fallback
    #   B=256  -> grid-less Pallas (full-array VMEM blocks)
    #   B=2048 -> batch-tiled Pallas (tb=1024, grid=2, "parallel" axis)
    for batch in (8, 256, 2048):
        xb = jax.random.normal(jax.random.fold_in(kx, batch),
                               (batch, features_dim), dtype=jnp.float32)
        fused = my_ac_model_forward_fused(xb, w_fused, b_fused, batch_tile=1024)
        jax.block_until_ready(fused)

        actor_out = fused[:, :last_layer_dim_pi]
        critic_out = fused[:, last_layer_dim_pi:]
        ref_actor, ref_critic = ref(xb)
        assert actor_out.shape == (batch, last_layer_dim_pi)
        assert critic_out.shape == (batch, last_layer_dim_vf)
        assert jnp.allclose(actor_out, ref_actor, atol=1e-5)
        assert jnp.allclose(critic_out, ref_critic, atol=1e-5)

    # Module-compatible two-output API (slicing only at this boundary).
    x_small = jax.random.normal(kx, (8, features_dim), dtype=jnp.float32)
    a_out, c_out = my_ac_model_forward(x_small, w_pi, b_pi, w_vf, b_vf)
    jax.block_until_ready((a_out, c_out))
    ra, rc = ref(x_small)
    assert jnp.allclose(a_out, ra, atol=1e-5)
    assert jnp.allclose(c_out, rc, atol=1e-5)

    print("KERNEL_OK")
</pallas_src>

<mosaic_0001>
module attributes {stable_mosaic.version = 11 : i64} {
  func.func @fused_ac_kernel(%arg0: memref<256x32xf32, #tpu.memory_space<vmem>>, %arg1: memref<32x128xf32, #tpu.memory_space<vmem>>, %arg2: memref<1x128xf32, #tpu.memory_space<vmem>>, %arg3: memref<256x128xf32, #tpu.memory_space<vmem>>) attributes {dimension_semantics = [], scalar_prefetch = 0 : i64, scratch_operands = 0 : i64, tpu.core_type = #tpu.core_type<tc>} {
    %c0 = arith.constant 0 : index
    %c0_0 = arith.constant 0 : index
    %0 = vector.load %arg0[%c0, %c0_0] : memref<256x32xf32, #tpu.memory_space<vmem>>, vector<256x32xf32>
    %c0_1 = arith.constant 0 : index
    %c0_2 = arith.constant 0 : index
    %1 = vector.load %arg1[%c0_1, %c0_2] : memref<32x128xf32, #tpu.memory_space<vmem>>, vector<32x128xf32>
    %cst = arith.constant dense<0.000000e+00> : vector<256x128xf32>
    %2 = tpu.matmul %0, %1, %cst {dimension_numbers = #tpu.dot_dimension_numbers<[1], [0], [0], [1], [0, 0, 1, 1], [], []>} : vector<256x32xf32>, vector<32x128xf32>, vector<256x128xf32> -> vector<256x128xf32>
    %c0_3 = arith.constant 0 : index
    %c0_4 = arith.constant 0 : index
    %3 = vector.load %arg2[%c0_3, %c0_4] : memref<1x128xf32, #tpu.memory_space<vmem>>, vector<1x128xf32>
    %4 = vector.broadcast %3 : vector<1x128xf32> to vector<256x128xf32>
    %5 = arith.addf %2, %4 : vector<256x128xf32>
    %cst_5 = arith.constant 0.000000e+00 : f32
    %6 = vector.broadcast %cst_5 : f32 to vector<256x128xf32>
    %7 = arith.maximumf %5, %6 : vector<256x128xf32>
    %c0_6 = arith.constant 0 : index
    %c0_7 = arith.constant 0 : index
    %8 = vector.load %arg3[%c0_6, %c0_7] : memref<256x128xf32, #tpu.memory_space<vmem>>, vector<256x128xf32>
    tpu.vector_store %arg3[%c0_6, %c0_7], %7 {strides = array<i32>} : memref<256x128xf32, #tpu.memory_space<vmem>>, vector<256x128xf32>,
    return
  }
}

</mosaic_0001>

<bundles_post_ra>
// kernel: tpu_custom_call.1
= control target key start
LH: loop header
LB: loop body
LE: loop exit
PB: predicated region body
PF: predicated region fallthrough
CT: control target
= control target key end

     0   :  { %vm58_vm0 = vcmask 261120   ;;  %s836_s0 = inlined_call_operand.vmem [shape: f32[256,32], index: 0, kind: input, shape index: {}]   ;;  %s837_s1 = inlined_call_operand.vmem [shape: f32[32,128], index: 1, kind: input, shape index: {}]   ;;  %s838_s2 = inlined_call_operand.vmem [shape: f32[1,128], index: 2, kind: input, shape index: {}]   ;;  %s839_s3 = inlined_call_operand.hbm [shape: f32[256,128], index: 3, kind: output, shape index: {}]  }
   0x1   :  { %v47_v0 = vld [vmem:[%s837_s1] sm:$0xff]  ;;  %v48_v1 = vld [vmem:[%s837_s1 + $0x8] sm:$0xff]  ;;  %v49_v2 = vld [vmem:[%s837_s1 + $0x10] sm:$0xff] }
   0x2   :  { %v585_v3 = vpack.c.bf16 %v48_v1, %v47_v0  ;;  %v50_v4 = vld [vmem:[%s837_s1 + $0x18] sm:$0xff]  ;;  %v15_v5 = vld [vmem:[%s836_s0] sm:$0xff]  ;;  %v16_v8 = vld [vmem:[%s836_s0 + $0x8] sm:$0xff] }
   0x3   :  { %v31_v6 = vld [vmem:[%s836_s0 + $0x80] sm:$0xff]  ;;  %v589_v7 = vpack.c.bf16 %v50_v4, %v49_v2  ;;  %537 = vmatprep.mubr.msk.f32.mxu0 %vm58_vm0, %v15_v5  ;;  %v32_v9 = vld [vmem:[%s836_s0 + $0x88] sm:$0xff]  ;;  %v17_v10 = vld [vmem:[%s836_s0 + $0x10] sm:$0xff] }
   0x4   :  { %561 = vmatprep.mubr.msk.f32.mxu1 %vm58_vm0, %v31_v6  ;;  %586 = vmatprep.subr.bf16.mxu0 %v585_v3  ;;  %v33_v11 = vld [vmem:[%s836_s0 + $0x90] sm:$0xff]  ;;  %v18_v12 = vld [vmem:[%s836_s0 + $0x18] sm:$0xff] }
   0x5   :  { %593 = vmatprep.subr.bf16.mxu1 %v585_v3  ;;  %588 = vmatpush3.bf16.msra.mxu0 %v585_v3  ;;  %v34_v13 = vld [vmem:[%s836_s0 + $0x98] sm:$0xff] }
   0x6   :  { %595 = vmatpush3.bf16.msra.mxu1 %v585_v3  ;;  %590 = vmatprep.subr.bf16.mxu0 %v589_v7 }
   0x7   :  { %594 = vmatprep.subr.bf16.mxu1 %v589_v7 }
   0x9   :  { %592 = vmatpush3.bf16.msra.mxu0 %v589_v7 }
   0xa   :  { %596 = vmatpush3.bf16.msra.mxu1 %v589_v7 }
   0xc   :  { %538 = vmatmul.mubr.msk.f32.vlgmr.msra.gmra.mrb[0].mxu0 %vm58_vm0, %v16_v8 }
   0xd   :  { %562 = vmatmul.mubr.msk.f32.vlgmr.msra.gmra.mrb[0].mxu1 %vm58_vm0, %v32_v9  ;;  %540 = vmatprep.mubr.msk.f32.mxu0 %vm58_vm0, %v17_v10 }
   0xe   :  { %564 = vmatprep.mubr.msk.f32.mxu1 %vm58_vm0, %v33_v11 }
   0xf   :  { %8 = vsyncpa [#allocation3], 0  ;;  %v19_v14 = vld [vmem:[%s836_s0 + $0x20] sm:$0xff]  ;;  %v20_v16 = vld [vmem:[%s836_s0 + $0x28] sm:$0xff] }
  0x10   :  { %v35_v15 = vld [vmem:[%s836_s0 + $0xa0] sm:$0xff]  ;;  %541 = vmatmul.mubr.msk.f32.gmra.mrb[2].mxu0 %vm58_vm0, %v18_v12  ;;  %v36_v17 = vld [vmem:[%s836_s0 + $0xa8] sm:$0xff]  ;;  %v21_v18 = vld [vmem:[%s836_s0 + $0x30] sm:$0xff] }
  0x11   :  { %565 = vmatmul.mubr.msk.f32.gmra.mrb[2].mxu1 %vm58_vm0, %v34_v13  ;;  %543 = vmatprep.mubr.msk.f32.mxu0 %vm58_vm0, %v19_v14  ;;  %v37_v19 = vld [vmem:[%s836_s0 + $0xb0] sm:$0xff]  ;;  %v22_v20 = vld [vmem:[%s836_s0 + $0x38] sm:$0xff]  ;;  %v23_v22 = vld [vmem:[%s836_s0 + $0x40] sm:$0xff] }
  0x12   :  { %567 = vmatprep.mubr.msk.f32.mxu1 %vm58_vm0, %v35_v15  ;;  %v38_v21 = vld [vmem:[%s836_s0 + $0xb8] sm:$0xff]  ;;  %v39_v23 = vld [vmem:[%s836_s0 + $0xc0] sm:$0xff]  ;;  %v24_v24 = vld [vmem:[%s836_s0 + $0x48] sm:$0xff] }
  0x13   :  { %v40_v25 = vld [vmem:[%s836_s0 + $0xc8] sm:$0xff]  ;;  %v25_v26 = vld [vmem:[%s836_s0 + $0x50] sm:$0xff]  ;;  %v26_v28 = vld [vmem:[%s836_s0 + $0x58] sm:$0xff] }
  0x14   :  { %544 = vmatmul.mubr.msk.f32.gmra.mrb[4].mxu0 %vm58_vm0, %v20_v16  ;;  %v41_v27 = vld [vmem:[%s836_s0 + $0xd0] sm:$0xff]  ;;  %v42_v29 = vld [vmem:[%s836_s0 + $0xd8] sm:$0xff]  ;;  %v27_v30 = vld [vmem:[%s836_s0 + $0x60] sm:$0xff] }
  0x15   :  { %568 = vmatmul.mubr.msk.f32.gmra.mrb[4].mxu1 %vm58_vm0, %v36_v17  ;;  %546 = vmatprep.mubr.msk.f32.mxu0 %vm58_vm0, %v21_v18  ;;  %v43_v31 = vld [vmem:[%s836_s0 + $0xe0] sm:$0xff]  ;;  %v28_v32 = vld [vmem:[%s836_s0 + $0x68] sm:$0xff]  ;;  %v29_v34 = vld [vmem:[%s836_s0 + $0x70] sm:$0xff] }
  0x16   :  { %570 = vmatprep.mubr.msk.f32.mxu1 %vm58_vm0, %v37_v19  ;;  %v44_v33 = vld [vmem:[%s836_s0 + $0xe8] sm:$0xff]  ;;  %v45_v35 = vld [vmem:[%s836_s0 + $0xf0] sm:$0xff]  ;;  %v30_v36 = vld [vmem:[%s836_s0 + $0x78] sm:$0xff] }
  0x17   :  { %v46_v37 = vld [vmem:[%s836_s0 + $0xf8] sm:$0xff]  ;;  %v790_v38 = vld [vmem:[%s838_s2] ss:$0 sm:$0xff]  ;;  %s624_s0 = smov [#allocation2]  }
  0x18   :  { %547 = vmatmul.mubr.msk.f32.gmra.mrb[6].mxu0 %vm58_vm0, %v22_v20  ;;  %s449_s2 = sshll.u32 %s624_s0, 4  ;;  %s450_s2 = int_to_ptr.vmem [resolvable:$true] %s449_s2 }
  0x19   :  { %571 = vmatmul.mubr.msk.f32.gmra.mrb[6].mxu1 %vm58_vm0, %v38_v21  ;;  %549 = vmatprep.mubr.msk.f32.mxu0 %vm58_vm0, %v23_v22  ;;  %s600_s29 = scalar_lea.vmem %s450_s2, 4096  ;;  %p605_p1 = scmp.lt.s32.totalorder %s450_s2, %s450_s2 }
  0x1a   :  { %573 = vmatprep.mubr.msk.f32.mxu1 %vm58_vm0, %v39_v23  ;;  %p601_p0 = scmp.ne.s32.totalorder %s450_s2, %s600_s29  ;;  %p606_p2 = scmp.lt.s32.totalorder %s600_s29, %s600_s29 }
  0x1c   :  { %550 = vmatmul.mubr.msk.f32.gmra.mrb[8].mxu0 %vm58_vm0, %v24_v24  ;;  %p607_p3 = por %p606_p2, %p605_p1 }
  0x1d   :  { %574 = vmatmul.mubr.msk.f32.gmra.mrb[8].mxu1 %vm58_vm0, %v40_v25  ;;  %552 = vmatprep.mubr.msk.f32.mxu0 %vm58_vm0, %v25_v26 }
  0x1e   :  { %576 = vmatprep.mubr.msk.f32.mxu1 %vm58_vm0, %v41_v27  ;;  %p608_p4 = pnand %p607_p3, %p601_p0 }
  0x20   :  { %553 = vmatmul.mubr.msk.f32.gmra.mrb[10].mxu0 %vm58_vm0, %v26_v28 }
  0x21   :  { %577 = vmatmul.mubr.msk.f32.gmra.mrb[10].mxu1 %vm58_vm0, %v42_v29  ;;  %555 = vmatprep.mubr.msk.f32.mxu0 %vm58_vm0, %v27_v30 }
  0x22   :  { %579 = vmatprep.mubr.msk.f32.mxu1 %vm58_vm0, %v43_v31 }
  0x24   :  { %556 = vmatmul.mubr.msk.f32.gmra.mrb[12].mxu0 %vm58_vm0, %v28_v32 }
  0x25   :  { %580 = vmatmul.mubr.msk.f32.gmra.mrb[12].mxu1 %vm58_vm0, %v44_v33  ;;  %558 = vmatprep.mubr.msk.f32.mxu0 %vm58_vm0, %v29_v34 }
  0x26   :  { %582 = vmatprep.mubr.msk.f32.mxu1 %vm58_vm0, %v45_v35 }
  0x28   :  { %559 = vmatmul.mubr.msk.f32.gmra.mrb[14].mxu0 %vm58_vm0, %v30_v36 }
  0x29   :  { %583 = vmatmul.mubr.msk.f32.gmra.mrb[14].mxu1 %vm58_vm0, %v46_v37 }
  0xdf   :  { %v539_v39 = vpop.f32.mrb[0].mxu0 }
  0xe0   :  { %v563_v40 = vpop.f32.mrb[0].mxu1  ;;  %v227_v41 = vadd.f32 %v539_v39, %v790_v38  ;;  %v221_v43 = vpop.f32.mrb[1].mxu0 }
  0xe1   :  { %v307_v42 = vadd.f32 %v563_v40, %v790_v38  ;;  %v301_v44 = vpop.f32.mrb[1].mxu1  ;;  %v222_v45 = vadd.f32 %v790_v38, %v221_v43 }
  0xe2   :  { %v302_v46 = vadd.f32 %v790_v38, %v301_v44  ;;  %v381_v47 = vmax.f32 %v227_v41, 0.0 }
  0xe3   :  { %v397_v48 = vmax.f32 %v307_v42, 0.0  ;;  %v380_v49 = vmax.f32 %v222_v45, 0.0  ;;  %v542_v51 = vpop.f32.mrb[2].mxu0 }
  0xe4   :  { %v396_v50 = vmax.f32 %v302_v46, 0.0  ;;  %v566_v52 = vpop.f32.mrb[2].mxu1  ;;  %413 = vst [vmem:[#allocation2 + $0x8] sm:$0xff] %v381_v47  ;;  %v237_v53 = vadd.f32 %v542_v51, %v790_v38  ;;  %v231_v55 = vpop.f32.mrb[3].mxu0 }
  0xe5   :  { %429 = vst [vmem:[#allocation2 + $0x88] sm:$0xff] %v397_v48  ;;  %v317_v54 = vadd.f32 %v566_v52, %v790_v38  ;;  %v311_v56 = vpop.f32.mrb[3].mxu1  ;;  %412 = vst [vmem:[#allocation2] sm:$0xff] %v380_v49  ;;  %v232_v57 = vadd.f32 %v790_v38, %v231_v55 }
  0xe6   :  { %428 = vst [vmem:[#allocation2 + $0x80] sm:$0xff] %v396_v50  ;;  %v312_v58 = vadd.f32 %v790_v38, %v311_v56  ;;  %v383_v59 = vmax.f32 %v237_v53, 0.0 }
  0xe7   :  { %v399_v60 = vmax.f32 %v317_v54, 0.0  ;;  %v382_v61 = vmax.f32 %v232_v57, 0.0  ;;  %v545_v63 = vpop.f32.mrb[4].mxu0 }
  0xe8   :  { %v398_v62 = vmax.f32 %v312_v58, 0.0  ;;  %v569_v0 = vpop.f32.mrb[4].mxu1  ;;  %415 = vst [vmem:[#allocation2 + $0x18] sm:$0xff] %v383_v59  ;;  %v247_v1 = vadd.f32 %v545_v63, %v790_v38  ;;  %v241_v3 = vpop.f32.mrb[5].mxu0 }
  0xe9   :  { %431 = vst [vmem:[#allocation2 + $0x98] sm:$0xff] %v399_v60  ;;  %v327_v2 = vadd.f32 %v569_v0, %v790_v38  ;;  %v321_v4 = vpop.f32.mrb[5].mxu1  ;;  %414 = vst [vmem:[#allocation2 + $0x10] sm:$0xff] %v382_v61  ;;  %v242_v5 = vadd.f32 %v790_v38, %v241_v3 }
  0xea   :  { %430 = vst [vmem:[#allocation2 + $0x90] sm:$0xff] %v398_v62  ;;  %v322_v6 = vadd.f32 %v790_v38, %v321_v4  ;;  %v385_v7 = vmax.f32 %v247_v1, 0.0 }
  0xeb   :  { %v401_v8 = vmax.f32 %v327_v2, 0.0  ;;  %v384_v9 = vmax.f32 %v242_v5, 0.0  ;;  %v548_v11 = vpop.f32.mrb[6].mxu0 }
  0xec   :  { %v400_v10 = vmax.f32 %v322_v6, 0.0  ;;  %v572_v12 = vpop.f32.mrb[6].mxu1  ;;  %417 = vst [vmem:[#allocation2 + $0x28] sm:$0xff] %v385_v7  ;;  %v257_v13 = vadd.f32 %v548_v11, %v790_v38  ;;  %v251_v15 = vpop.f32.mrb[7].mxu0 }
  0xed   :  { %433 = vst [vmem:[#allocation2 + $0xa8] sm:$0xff] %v401_v8  ;;  %v337_v14 = vadd.f32 %v572_v12, %v790_v38  ;;  %v331_v16 = vpop.f32.mrb[7].mxu1  ;;  %416 = vst [vmem:[#allocation2 + $0x20] sm:$0xff] %v384_v9  ;;  %v252_v17 = vadd.f32 %v790_v38, %v251_v15 }
  0xee   :  { %432 = vst [vmem:[#allocation2 + $0xa0] sm:$0xff] %v400_v10  ;;  %v332_v18 = vadd.f32 %v790_v38, %v331_v16  ;;  %v387_v19 = vmax.f32 %v257_v13, 0.0 }
  0xef   :  { %v403_v20 = vmax.f32 %v337_v14, 0.0  ;;  %v386_v21 = vmax.f32 %v252_v17, 0.0  ;;  %v551_v23 = vpop.f32.mrb[8].mxu0 }
  0xf0   :  { %v402_v22 = vmax.f32 %v332_v18, 0.0  ;;  %v575_v24 = vpop.f32.mrb[8].mxu1  ;;  %419 = vst [vmem:[#allocation2 + $0x38] sm:$0xff] %v387_v19  ;;  %v267_v25 = vadd.f32 %v551_v23, %v790_v38  ;;  %v261_v27 = vpop.f32.mrb[9].mxu0 }
  0xf1   :  { %435 = vst [vmem:[#allocation2 + $0xb8] sm:$0xff] %v403_v20  ;;  %v347_v26 = vadd.f32 %v575_v24, %v790_v38  ;;  %v341_v28 = vpop.f32.mrb[9].mxu1  ;;  %418 = vst [vmem:[#allocation2 + $0x30] sm:$0xff] %v386_v21  ;;  %v262_v29 = vadd.f32 %v790_v38, %v261_v27 }
  0xf2   :  { %434 = vst [vmem:[#allocation2 + $0xb0] sm:$0xff] %v402_v22  ;;  %v342_v30 = vadd.f32 %v790_v38, %v341_v28  ;;  %v389_v31 = vmax.f32 %v267_v25, 0.0 }
  0xf3   :  { %v405_v32 = vmax.f32 %v347_v26, 0.0  ;;  %v388_v33 = vmax.f32 %v262_v29, 0.0  ;;  %v554_v35 = vpop.f32.mrb[10].mxu0 }
  0xf4   :  { %v404_v34 = vmax.f32 %v342_v30, 0.0  ;;  %v578_v36 = vpop.f32.mrb[10].mxu1  ;;  %421 = vst [vmem:[#allocation2 + $0x48] sm:$0xff] %v389_v31  ;;  %v277_v37 = vadd.f32 %v554_v35, %v790_v38  ;;  %v271_v40 = vpop.f32.mrb[11].mxu0 }
  0xf5   :  { %437 = vst [vmem:[#allocation2 + $0xc8] sm:$0xff] %v405_v32  ;;  %v357_v39 = vadd.f32 %v578_v36, %v790_v38  ;;  %v351_v41 = vpop.f32.mrb[11].mxu1  ;;  %420 = vst [vmem:[#allocation2 + $0x40] sm:$0xff] %v388_v33  ;;  %v272_v42 = vadd.f32 %v790_v38, %v271_v40 }
  0xf6   :  { %436 = vst [vmem:[#allocation2 + $0xc0] sm:$0xff] %v404_v34  ;;  %v352_v43 = vadd.f32 %v790_v38, %v351_v41  ;;  %v391_v44 = vmax.f32 %v277_v37, 0.0 }
  0xf7   :  { %v407_v45 = vmax.f32 %v357_v39, 0.0  ;;  %v390_v46 = vmax.f32 %v272_v42, 0.0  ;;  %v557_v48 = vpop.f32.mrb[12].mxu0 }
  0xf8   :  { %v406_v47 = vmax.f32 %v352_v43, 0.0  ;;  %v581_v49 = vpop.f32.mrb[12].mxu1  ;;  %423 = vst [vmem:[#allocation2 + $0x58] sm:$0xff] %v391_v44  ;;  %v287_v50 = vadd.f32 %v557_v48, %v790_v38  ;;  %v281_v52 = vpop.f32.mrb[13].mxu0 }
  0xf9   :  { %439 = vst [vmem:[#allocation2 + $0xd8] sm:$0xff] %v407_v45  ;;  %v367_v51 = vadd.f32 %v581_v49, %v790_v38  ;;  %v361_v53 = vpop.f32.mrb[13].mxu1  ;;  %422 = vst [vmem:[#allocation2 + $0x50] sm:$0xff] %v390_v46  ;;  %v282_v54 = vadd.f32 %v790_v38, %v281_v52 }
  0xfa   :  { %438 = vst [vmem:[#allocation2 + $0xd0] sm:$0xff] %v406_v47  ;;  %v362_v55 = vadd.f32 %v790_v38, %v361_v53  ;;  %v393_v56 = vmax.f32 %v287_v50, 0.0 }
  0xfb   :  { %v409_v57 = vmax.f32 %v367_v51, 0.0  ;;  %v392_v58 = vmax.f32 %v282_v54, 0.0  ;;  %v560_v60 = vpop.f32.mrb[14].mxu0 }
  0xfc   :  { %v408_v59 = vmax.f32 %v362_v55, 0.0  ;;  %v584_v61 = vpop.f32.mrb[14].mxu1  ;;  %425 = vst [vmem:[#allocation2 + $0x68] sm:$0xff] %v393_v56  ;;  %v297_v62 = vadd.f32 %v560_v60, %v790_v38  ;;  %v291_v0 = vpop.f32.mrb[15].mxu0 }
  0xfd   :  { %441 = vst [vmem:[#allocation2 + $0xe8] sm:$0xff] %v409_v57  ;;  %v377_v63 = vadd.f32 %v584_v61, %v790_v38  ;;  %v371_v1 = vpop.f32.mrb[15].mxu1  ;;  %424 = vst [vmem:[#allocation2 + $0x60] sm:$0xff] %v392_v58  ;;  %v292_v2 = vadd.f32 %v790_v38, %v291_v0 }
  0xfe   :  { %440 = vst [vmem:[#allocation2 + $0xe0] sm:$0xff] %v408_v59  ;;  %v372_v3 = vadd.f32 %v790_v38, %v371_v1  ;;  %v395_v4 = vmax.f32 %v297_v62, 0.0 }
  0xff   :  { %v411_v5 = vmax.f32 %v377_v63, 0.0  ;;  %v394_v6 = vmax.f32 %v292_v2, 0.0 }
 0x100   :  { %v410_v7 = vmax.f32 %v372_v3, 0.0  ;;  %427 = vst [vmem:[#allocation2 + $0x78] sm:$0xff] %v395_v4 }
 0x101   :  { %443 = vst [vmem:[#allocation2 + $0xf8] sm:$0xff] %v411_v5  ;;  %426 = vst [vmem:[#allocation2 + $0x70] sm:$0xff] %v394_v6 }
 0x102   :  { %442 = vst [vmem:[#allocation2 + $0xf0] sm:$0xff] %v410_v7 }
 0x103   :  { %611 = shalt.err (!%p608_p4)
}
 0x104   :  { %s612_s5 = scalar_lea.hbm %s839_s3, 4096 }
 0x105   :  { %p613_p5 = scmp.ne.s32.totalorder %s839_s3, %s612_s5  ;;  %p616_p6 = scmp.lt.u32.totalorder %s612_s5, %s839_s3 }
 0x107   :  { %p618_p7 = pnand %p616_p6, %p613_p5 }
 0x109   :  { %621 = shalt.err (!%p618_p7)
}
 0x10a   :  { %s625_s10 = smov 128   ;;  %s626_s11 = smov 8  }
 0x10b   :  { %455 = dma.vmem_to_hbm [thread:$0]  %s450_s2, 4096, %s839_s3, [#allocation3], %s625_s10, %s625_s10, %s626_s11  }
 0x10c   :  { %622 = dma.done.wait [#allocation3], 4096  }
 0x10d   :  { %623 = vsyncadd [#allocation3], 4294963200 }
 0x10e   :  { %459 = vsyncpa [#allocation3], 1 }

</bundles_post_ra>
